<compile_context>
chip_gen: v7x
topology: tpu7x:2x2x1
jax: 0.10.0
libtpu: 0.0.40
codegen_flags: <defaults>
</compile_context>

<pallas_src>
import functools

import jax
import jax.numpy as jnp
from jax import lax
from jax.experimental import pallas as pl
from jax.experimental.pallas import tpu as pltpu

_LANES = 128


def _ce_mask_kernel(pred_ref, gt_ref, mask_ref, tlogp_ref, msum_ref,
                    *, n_classes, s_tile, sub, steps_per_group, n_rows):
    """One (C, s_tile, 128) tile of masked soft-target cross entropy.

    C sits on a leading (non-tiled) axis, spatial rows on sublanes, 128
    positions per lane row.  Accumulates t*log_softmax and the mask into a
    tiny (sub, 128) per-(group, batch) output block resident across the
    spatial (reduction) grid axis.
    """
    s = pl.program_id(2)

    @pl.when(s == 0)
    def _():
        tlogp_ref[...] = jnp.zeros_like(tlogp_ref)
        msum_ref[...] = jnp.zeros_like(msum_ref)

    m = mask_ref[...].astype(jnp.float32)     # (C, s_tile, 128)
    p = pred_ref[...].astype(jnp.float32)
    t = gt_ref[...].astype(jnp.float32)

    if n_rows % s_tile != 0:                  # static: a partial last tile exists
        # Mask out rows past the end of the array (OOB rows of the partial
        # block are unspecified, so zero them before any arithmetic).
        bs = pl.program_id(0) * steps_per_group + s
        rows_left = n_rows - bs * s_tile
        row = lax.broadcasted_iota(jnp.int32, (n_classes, s_tile, _LANES), 1)
        valid = row < rows_left
        zero = jnp.float32(0.0)
        m = jnp.where(valid, m, zero)
        p = jnp.where(valid, p, zero)
        t = jnp.where(valid, t, zero)

    x = p * m                                  # masked logits
    tw = t * m                                 # masked soft targets

    # log-softmax over the class axis: C is a leading (non-tiled) dim, so
    # these reductions are plain cross-vreg VPU max/add (no XLU).
    x_max = jnp.max(x, axis=0, keepdims=True)
    z = x - x_max
    lse = jnp.log(jnp.sum(jnp.exp(z), axis=0, keepdims=True))
    logp = z - lse

    contrib = tw * logp                        # (C, s_tile, 128)

    # Fold (C, s_tile, 128) -> (sub, 128): split the sublane axis at 8-row
    # tile boundaries (layout-preserving reshape) and reduce the leading
    # axes with cross-vreg adds (pure VPU).
    groups = n_classes * (s_tile // sub)
    tlogp_ref[...] += jnp.sum(contrib.reshape(groups, sub, _LANES), axis=0)
    msum_ref[...] += jnp.sum(m.reshape(groups, sub, _LANES), axis=0)


def ptv_estimator_loss(pred0, gt0, mask, *, target_step_bytes=6 << 20):
    """pred0 = pred[0], gt0 = gt[0], mask = gt[1]; all NCHW, same shape.

    mask may be bool / int8 / float; pred0 / gt0 may be bf16 or f32 — the
    kernel upcasts to f32 internally.
    """
    N, C, H, W = pred0.shape
    assert gt0.shape == pred0.shape and mask.shape == pred0.shape
    HW = H * W
    M = N * HW                       # CE 'mean' divides by all positions

    S = -(-HW // _LANES)             # spatial rows of 128 lanes
    lane_pad = S * _LANES - HW

    def to_view(a):
        a = a.reshape(N, C, HW)      # free reshape, no transpose
        if lane_pad:
            # Only hit when H*W % 128 != 0 (zero padding contributes 0 to
            # both accumulators; the mean still divides by the original M).
            a = jnp.pad(a, ((0, 0), (0, 0), (0, lane_pad)))
        return a.reshape(N, C, S, _LANES)

    p = to_view(pred0)
    g = to_view(gt0)
    m = to_view(mask)

    # Tile choice: biggest multiple-of-8 row count keeping the combined
    # per-step traffic around target_step_bytes (real itemsizes).
    itemsize_total = p.dtype.itemsize + g.dtype.itemsize + m.dtype.itemsize
    bytes_per_row = C * _LANES * itemsize_total
    max_rows = max(8, (target_step_bytes // bytes_per_row) // 8 * 8)
    s_tile = S if S <= max_rows else max_rows
    sub = 8 if s_tile % 8 == 0 else s_tile          # accumulator sublanes

    n_steps = -(-S // s_tile)
    # v7x: if possible, split the spatial step range into two parallel groups
    # so both TensorCores stay busy regardless of N (harmless on v5e/v6e).
    groups = 2 if (n_steps >= 2 and n_steps % 2 == 0) else 1
    steps_per_group = n_steps // groups

    kernel = functools.partial(
        _ce_mask_kernel, n_classes=C, s_tile=s_tile, sub=sub,
        steps_per_group=steps_per_group, n_rows=S)

    in_idx = lambda gr, n, s: (n, 0, gr * steps_per_group + s, 0)
    in_spec = pl.BlockSpec((None, C, s_tile, _LANES), in_idx)
    out_spec = pl.BlockSpec((None, None, sub, _LANES),
                            lambda gr, n, s: (gr, n, 0, 0))

    step_bytes = C * s_tile * _LANES * itemsize_total
    vmem_limit = int(min(2 * step_bytes + (16 << 20), 56 << 20))

    tlogp_parts, mask_parts = pl.pallas_call(
        kernel,
        out_shape=(
            jax.ShapeDtypeStruct((groups, N, sub, _LANES), jnp.float32),
            jax.ShapeDtypeStruct((groups, N, sub, _LANES), jnp.float32),
        ),
        grid_spec=pltpu.PrefetchScalarGridSpec(
            num_scalar_prefetch=0,
            grid=(groups, N, steps_per_group),
            in_specs=[in_spec, in_spec, in_spec],
            out_specs=(out_spec, out_spec),
        ),
        compiler_params=pltpu.CompilerParams(
            dimension_semantics=("parallel", "parallel", "arbitrary"),
            vmem_limit_bytes=vmem_limit),
    )(p, g, m)

    # Tiny final reductions on the small per-(group, batch) partials.
    loss_sum = -jnp.sum(tlogp_parts)
    mask_sum = jnp.sum(mask_parts)
    ce_mean = loss_sum / jnp.float32(M)
    # else-branch of the PyTorch module: L1Loss(zeros(1), zeros(1)) == 0
    return jnp.where(mask_sum > 0, ce_mean, jnp.float32(0.0))


def _reference_loss(pred0, gt0, mask):
    """Pure-JAX reference mirroring the PyTorch forward."""
    x = pred0 * mask
    t = gt0 * mask
    logp = jax.nn.log_softmax(x, axis=1)          # softmax over C (dim 1)
    per_pos = -jnp.sum(t * logp, axis=1)          # (N, H, W)
    ce = jnp.mean(per_pos)
    return jnp.where(jnp.sum(mask) > 0, ce, jnp.float32(0.0))


if __name__ == "__main__":
    key = jax.random.PRNGKey(0)
    k1, k2, k3 = jax.random.split(key, 3)

    N, C, H, W = 2, 4, 16, 16
    pred0 = jax.random.normal(k1, (N, C, H, W), dtype=jnp.float32)   # pred[0]
    gt0 = jax.random.uniform(k2, (N, C, H, W), dtype=jnp.float32)    # gt[0]
    # gt[1]: possible dose mask (binary), same shape
    mask = (jax.random.uniform(k3, (N, C, H, W)) > 0.3).astype(jnp.float32)

    out = jax.block_until_ready(ptv_estimator_loss(pred0, gt0, mask))
    ref = _reference_loss(pred0, gt0, mask)
    assert jnp.allclose(out, ref, rtol=1e-5, atol=1e-5), (out, ref)

    # also exercise the empty-mask branch (returns 0.0)
    zero_mask = jnp.zeros_like(mask)
    out0 = jax.block_until_ready(ptv_estimator_loss(pred0, gt0, zero_mask))
    assert jnp.allclose(out0, 0.0), out0

    print("KERNEL_OK")
</pallas_src>

<mosaic_0001>
module attributes {stable_mosaic.version = 11 : i64} {
  func.func @_ce_mask_kernel(%arg0: i32, %arg1: i32, %arg2: i32, %arg3: memref<1x4x2x128xf32, #tpu.memory_space<vmem>>, %arg4: memref<1x4x2x128xf32, #tpu.memory_space<vmem>>, %arg5: memref<1x4x2x128xf32, #tpu.memory_space<vmem>>, %arg6: memref<1x1x2x128xf32, #tpu.memory_space<vmem>>, %arg7: memref<1x1x2x128xf32, #tpu.memory_space<vmem>>) attributes {dimension_semantics = [#tpu.dimension_semantics<parallel>, #tpu.dimension_semantics<parallel>, #tpu.dimension_semantics<arbitrary>], iteration_bounds = array<i64: 1, 2, 1>, scalar_prefetch = 0 : i64, scratch_operands = 0 : i64, tpu.core_type = #tpu.core_type<tc>, window_params = [{transform_indices = @transform_0, window_bounds = array<i64: 1, 4, 2, 128>}, {transform_indices = @transform_1, window_bounds = array<i64: 1, 4, 2, 128>}, {transform_indices = @transform_2, window_bounds = array<i64: 1, 4, 2, 128>}, {transform_indices = @transform_3, window_bounds = array<i64: 1, 1, 2, 128>}, {transform_indices = @transform_4, window_bounds = array<i64: 1, 1, 2, 128>}]} {
    %c0_i32 = arith.constant 0 : i32
    %0 = arith.cmpi eq, %arg2, %c0_i32 : i32
    %1 = arith.extui %0 : i1 to i32
    %c0_i32_0 = arith.constant 0 : i32
    %2 = arith.cmpi ne, %1, %c0_i32_0 : i32
    scf.if %2 {
      %cst_31 = arith.constant 0.000000e+00 : f32
      %36 = vector.broadcast %cst_31 : f32 to vector<2x128xf32>
      %c0_32 = arith.constant 0 : index
      %c0_33 = arith.constant 0 : index
      %c0_34 = arith.constant 0 : index
      %c0_35 = arith.constant 0 : index
      %37 = vector.load %arg6[%c0_32, %c0_33, %c0_34, %c0_35] : memref<1x1x2x128xf32, #tpu.memory_space<vmem>>, vector<1x1x2x128xf32>
      %38 = vector.shape_cast %37 : vector<1x1x2x128xf32> to vector<2x128xf32>
      %39 = vector.shape_cast %36 : vector<2x128xf32> to vector<1x1x2x128xf32>
      tpu.vector_store %arg6[%c0_32, %c0_33, %c0_34, %c0_35], %39 {strides = array<i32>} : memref<1x1x2x128xf32, #tpu.memory_space<vmem>>, vector<1x1x2x128xf32>,
      %cst_36 = arith.constant 0.000000e+00 : f32
      %40 = vector.broadcast %cst_36 : f32 to vector<2x128xf32>
      %c0_37 = arith.constant 0 : index
      %c0_38 = arith.constant 0 : index
      %c0_39 = arith.constant 0 : index
      %c0_40 = arith.constant 0 : index
      %41 = vector.load %arg7[%c0_37, %c0_38, %c0_39, %c0_40] : memref<1x1x2x128xf32, #tpu.memory_space<vmem>>, vector<1x1x2x128xf32>
      %42 = vector.shape_cast %41 : vector<1x1x2x128xf32> to vector<2x128xf32>
      %43 = vector.shape_cast %40 : vector<2x128xf32> to vector<1x1x2x128xf32>
      tpu.vector_store %arg7[%c0_37, %c0_38, %c0_39, %c0_40], %43 {strides = array<i32>} : memref<1x1x2x128xf32, #tpu.memory_space<vmem>>, vector<1x1x2x128xf32>,
    } else {
    }
    %c0 = arith.constant 0 : index
    %c0_1 = arith.constant 0 : index
    %c0_2 = arith.constant 0 : index
    %c0_3 = arith.constant 0 : index
    %3 = vector.load %arg5[%c0, %c0_1, %c0_2, %c0_3] : memref<1x4x2x128xf32, #tpu.memory_space<vmem>>, vector<1x4x2x128xf32>
    %4 = vector.shape_cast %3 : vector<1x4x2x128xf32> to vector<4x2x128xf32>
    %c0_4 = arith.constant 0 : index
    %c0_5 = arith.constant 0 : index
    %c0_6 = arith.constant 0 : index
    %c0_7 = arith.constant 0 : index
    %5 = vector.load %arg3[%c0_4, %c0_5, %c0_6, %c0_7] : memref<1x4x2x128xf32, #tpu.memory_space<vmem>>, vector<1x4x2x128xf32>
    %6 = vector.shape_cast %5 : vector<1x4x2x128xf32> to vector<4x2x128xf32>
    %c0_8 = arith.constant 0 : index
    %c0_9 = arith.constant 0 : index
    %c0_10 = arith.constant 0 : index
    %c0_11 = arith.constant 0 : index
    %7 = vector.load %arg4[%c0_8, %c0_9, %c0_10, %c0_11] : memref<1x4x2x128xf32, #tpu.memory_space<vmem>>, vector<1x4x2x128xf32>
    %8 = vector.shape_cast %7 : vector<1x4x2x128xf32> to vector<4x2x128xf32>
    %9 = arith.mulf %6, %4 : vector<4x2x128xf32>
    %10 = arith.mulf %8, %4 : vector<4x2x128xf32>
    %cst = arith.constant dense<0xFF800000> : vector<2x128xf32>
    %11 = vector.multi_reduction <maximumf>, %9, %cst [0] : vector<4x2x128xf32> to vector<2x128xf32>
    %12 = vector.shape_cast %11 : vector<2x128xf32> to vector<1x2x128xf32>
    %13 = vector.broadcast %12 : vector<1x2x128xf32> to vector<4x2x128xf32>
    %14 = arith.subf %9, %13 : vector<4x2x128xf32>
    %15 = math.exp %14 : vector<4x2x128xf32>
    %cst_12 = arith.constant dense<0.000000e+00> : vector<2x128xf32>
    %16 = vector.multi_reduction <add>, %15, %cst_12 [0] : vector<4x2x128xf32> to vector<2x128xf32>
    %17 = vector.shape_cast %16 : vector<2x128xf32> to vector<1x2x128xf32>
    %18 = math.log %17 : vector<1x2x128xf32>
    %19 = vector.broadcast %18 : vector<1x2x128xf32> to vector<4x2x128xf32>
    %20 = arith.subf %14, %19 : vector<4x2x128xf32>
    %21 = arith.mulf %10, %20 : vector<4x2x128xf32>
    %c0_13 = arith.constant 0 : index
    %c0_14 = arith.constant 0 : index
    %c0_15 = arith.constant 0 : index
    %c0_16 = arith.constant 0 : index
    %22 = vector.load %arg6[%c0_13, %c0_14, %c0_15, %c0_16] : memref<1x1x2x128xf32, #tpu.memory_space<vmem>>, vector<1x1x2x128xf32>
    %23 = vector.shape_cast %22 : vector<1x1x2x128xf32> to vector<2x128xf32>
    %cst_17 = arith.constant dense<0.000000e+00> : vector<2x128xf32>
    %24 = vector.multi_reduction <add>, %21, %cst_17 [0] : vector<4x2x128xf32> to vector<2x128xf32>
    %25 = arith.addf %23, %24 : vector<2x128xf32>
    %c0_18 = arith.constant 0 : index
    %c0_19 = arith.constant 0 : index
    %c0_20 = arith.constant 0 : index
    %c0_21 = arith.constant 0 : index
    %26 = vector.load %arg6[%c0_18, %c0_19, %c0_20, %c0_21] : memref<1x1x2x128xf32, #tpu.memory_space<vmem>>, vector<1x1x2x128xf32>
    %27 = vector.shape_cast %26 : vector<1x1x2x128xf32> to vector<2x128xf32>
    %28 = vector.shape_cast %25 : vector<2x128xf32> to vector<1x1x2x128xf32>
    tpu.vector_store %arg6[%c0_18, %c0_19, %c0_20, %c0_21], %28 {strides = array<i32>} : memref<1x1x2x128xf32, #tpu.memory_space<vmem>>, vector<1x1x2x128xf32>,
    %c0_22 = arith.constant 0 : index
    %c0_23 = arith.constant 0 : index
    %c0_24 = arith.constant 0 : index
    %c0_25 = arith.constant 0 : index
    %29 = vector.load %arg7[%c0_22, %c0_23, %c0_24, %c0_25] : memref<1x1x2x128xf32, #tpu.memory_space<vmem>>, vector<1x1x2x128xf32>
    %30 = vector.shape_cast %29 : vector<1x1x2x128xf32> to vector<2x128xf32>
    %cst_26 = arith.constant dense<0.000000e+00> : vector<2x128xf32>
    %31 = vector.multi_reduction <add>, %4, %cst_26 [0] : vector<4x2x128xf32> to vector<2x128xf32>
    %32 = arith.addf %30, %31 : vector<2x128xf32>
    %c0_27 = arith.constant 0 : index
    %c0_28 = arith.constant 0 : index
    %c0_29 = arith.constant 0 : index
    %c0_30 = arith.constant 0 : index
    %33 = vector.load %arg7[%c0_27, %c0_28, %c0_29, %c0_30] : memref<1x1x2x128xf32, #tpu.memory_space<vmem>>, vector<1x1x2x128xf32>
    %34 = vector.shape_cast %33 : vector<1x1x2x128xf32> to vector<2x128xf32>
    %35 = vector.shape_cast %32 : vector<2x128xf32> to vector<1x1x2x128xf32>
    tpu.vector_store %arg7[%c0_27, %c0_28, %c0_29, %c0_30], %35 {strides = array<i32>} : memref<1x1x2x128xf32, #tpu.memory_space<vmem>>, vector<1x1x2x128xf32>,
    return
  }
  func.func @transform_0(%arg0: i32, %arg1: i32, %arg2: i32) -> (i32, i32, i32, i32) {
    %c1_i32 = arith.constant 1 : i32
    %0 = arith.muli %arg0, %c1_i32 : i32
    %1 = arith.addi %0, %arg2 : i32
    %c0_i32 = arith.constant 0 : i32
    %c0_i32_0 = arith.constant 0 : i32
    %c0_i32_1 = arith.constant 0 : i32
    return %arg1, %c0_i32, %1, %c0_i32_0 : i32, i32, i32, i32
  }
  func.func @transform_1(%arg0: i32, %arg1: i32, %arg2: i32) -> (i32, i32, i32, i32) {
    %c1_i32 = arith.constant 1 : i32
    %0 = arith.muli %arg0, %c1_i32 : i32
    %1 = arith.addi %0, %arg2 : i32
    %c0_i32 = arith.constant 0 : i32
    %c0_i32_0 = arith.constant 0 : i32
    %c0_i32_1 = arith.constant 0 : i32
    return %arg1, %c0_i32, %1, %c0_i32_0 : i32, i32, i32, i32
  }
  func.func @transform_2(%arg0: i32, %arg1: i32, %arg2: i32) -> (i32, i32, i32, i32) {
    %c1_i32 = arith.constant 1 : i32
    %0 = arith.muli %arg0, %c1_i32 : i32
    %1 = arith.addi %0, %arg2 : i32
    %c0_i32 = arith.constant 0 : i32
    %c0_i32_0 = arith.constant 0 : i32
    %c0_i32_1 = arith.constant 0 : i32
    return %arg1, %c0_i32, %1, %c0_i32_0 : i32, i32, i32, i32
  }
  func.func @transform_3(%arg0: i32, %arg1: i32, %arg2: i32) -> (i32, i32, i32, i32) {
    %c0_i32 = arith.constant 0 : i32
    %c0_i32_0 = arith.constant 0 : i32
    %c0_i32_1 = arith.constant 0 : i32
    return %arg0, %arg1, %c0_i32, %c0_i32_0 : i32, i32, i32, i32
  }
  func.func @transform_4(%arg0: i32, %arg1: i32, %arg2: i32) -> (i32, i32, i32, i32) {
    %c0_i32 = arith.constant 0 : i32
    %c0_i32_0 = arith.constant 0 : i32
    %c0_i32_1 = arith.constant 0 : i32
    return %arg0, %arg1, %c0_i32, %c0_i32_0 : i32, i32, i32, i32
  }
}

</mosaic_0001>

<bundles_post_ra>
// kernel: tpu_custom_call.1
= control target key start
LH: loop header
LB: loop body
LE: loop exit
PB: predicated region body
PF: predicated region fallthrough
CT: control target
= control target key end

     0   :  { %s1377_s0 = inlined_call_operand.hbm [shape: f32[2,4,2,128], index: 0, kind: input, shape index: {}]   ;;  %s1378_s1 = inlined_call_operand.hbm [shape: f32[2,4,2,128], index: 1, kind: input, shape index: {}]   ;;  %s1379_s2 = inlined_call_operand.hbm [shape: f32[2,4,2,128], index: 2, kind: input, shape index: {}]   ;;  %s1380_s3 = inlined_call_operand.hbm [shape: f32[1,2,2,128], index: 3, kind: output, shape index: {0}]   ;;  %s1381_s4 = inlined_call_operand.hbm [shape: f32[1,2,2,128], index: 4, kind: output, shape index: {1}]  }
   0x1   :  { %1393 = sst [smem:[#allocation19_spill]] %s1378_s1 }
   0x2   :  { %10 = vsyncpa [#allocation3], 0 }
   0x3   :  { %12 = vsyncpa [#allocation3 + $0x1], 0 }
   0x4   :  { %13 = vsyncpa [#allocation6], 0 }
   0x5   :  { %15 = vsyncpa [#allocation6 + $0x1], 0 }
   0x6   :  { %16 = vsyncpa [#allocation4], 0 }
   0x7   :  { %18 = vsyncpa [#allocation4 + $0x1], 0 }
   0x8   :  { %19 = vsyncpa [#allocation10], 0 }
   0x9   :  { %21 = vsyncpa [#allocation10 + $0x1], 0  ;;  %s997_s15 = smov 0   ;;  %s999_s16 = smov 0  }
   0xa   :  { %s1001_s17 = smov 0   ;;  %s1003_s18 = smov 0  }
   0xb   :  { %s1005_s19 = smov 0   ;;  %s1007_s20 = smov 0  }
   0xc LB: > { %1394 = sst [smem:[#allocation15_spill]] %s958_s19  ;;  %s1028_s21 = sadd.s32 4294967295, %s962_s20   ;;  %s962_s20 = sphi %s1007_s20, %s27_s20   ;;  %s958_s19 = sphi %s1005_s19, %s1419_s19   ;;  %s954_s18 = sphi %s1003_s18, %s1418_s18   ;;  %s950_s17 = sphi %s1001_s17, %s1422_s17   ;;  %s946_s16 = sphi %s999_s16, %s1421_s16   ;;  %s942_s15 = sphi %s997_s15, %s1420_s15  }
   0xd   : > { %1395 = sst [smem:[#allocation16_spill]] %s962_s20  ;;  %s637_s22 = sadd.s32 4294967294, %s962_s20  }
   0xe   : > { %s42_s23 = sadd.s32 1, %s958_s19  ;;  %s57_s24 = sadd.s32 1, %s950_s17 }
   0xf   : > { %p44_p0 = scmp.ge.s32.totalorder %s42_s23, 2  ;;  %p64_p1 = scmp.ne.s32.totalorder %s950_s17, %s946_s16 }
  0x10   : > { %p65_p2 = scmp.eq.s32.totalorder %s962_s20, 0  ;;  %p70_p3 = scmp.ne.s32.totalorder %s946_s16, %s942_s15 }
  0x11   : > { %s1424_s23 = smov (%p44_p0, %s42_s23), 0  ;;  %p71_p5 = scmp.eq.s32.totalorder %s1028_s21, 0 }
  0x12   : > { %1396 = sst [smem:[#allocation17_spill]] %s1424_s23  ;;  %p1040_p4 = por %p65_p2, %p64_p1 }
  0x13   : > { %s52_s26 = ssub.s32 %s958_s19, %s1424_s23  ;;  %p156_p6 = scmp.eq.s32.totalorder %s1028_s21, 1 }
  0x14   : > { %p55_p7 = scmp.eq.s32.totalorder %s52_s26, 0  ;;  %p1048_p8 = por %p71_p5, %p70_p3 }
  0x15   : > { %p1052_p9 = por %p156_p6, %p64_p1  ;;  %p162_p10 = scmp.eq.s32.totalorder %s637_s22, 1 }
  0x16   : > { %s1398_s27 = scalar_select %p1048_p8, 1, 0 }
  0x17   : > { %s1399_s28 = scalar_select %p1052_p9, 1, 0 }
  0x18   : > { %s1057_s29 = scalar_select %p55_p7, %s950_s17, %s57_s24  }
  0x19   : > { %p1059_p11 = por %p162_p10, %p70_p3  ;;  %p691_p13 = scmp.lt.s32.totalorder %s962_s20, 2 }
  0x1a   : > { %1400 = sst [smem:[#allocation18_spill]] %s1057_s29  ;;  %s1382_s5 = sand.u32 1, %s950_s17  }
  0x1b   : > { %s1401_s30 = scalar_select %p1059_p11, 1, 0 }
  0x1c   : > { %s1068_s6 = sshll.u32 %s1382_s5, 3  ;;  %s1071_s7 = sshll.u32 %s958_s19, 7 }
  0x1d   : > { %p1075_p0 = pnand %p691_p13, %p1040_p4  ;;  %s233_s9 = sand.u32 1, %s962_s20  }
  0x1e   : > { %s1403_s1 = sld [smem:[#allocation19_spill]]  ;;  %s237_s13 = scalar_lea.vmem [#allocation5], %s1068_s6 }
  0x1f   : > { %s246_s14 = sshll.u32 %s237_s13, 4  ;;  %s1091_s22 = scalar_lea.sflag [#allocation6], %s233_s9  ;;  %s1088_s14 = int_to_ptr.vmem [resolvable:$true] %s246_s14 }
  0x20   : > { %p1097_p4 = pneg %p1075_p0 }
  0x24   : > { %s1084_s12 = scalar_lea.hbm %s1403_s1, %s1071_s7  ;;  %s759_s11 = scalar_lea.hbm %s1403_s1, 256 }
  0x25   : > { %s754_s24 = scalar_lea.hbm %s1084_s12, 128  ;;  %p760_p7 = scmp.lt.u32.totalorder %s1084_s12, %s1403_s1 }
  0x26   : > { %p755_p3 = scmp.ne.s32.totalorder %s1084_s12, %s754_s24  ;;  %p761_p10 = scmp.lt.u32.totalorder %s759_s11, %s754_s24 }
  0x27   : > { %p763_p12 = scmp.lt.u32.totalorder %s754_s24, %s1084_s12 }
  0x28   : > { %p757_p5 = pnand %p1097_p4, %p755_p3  ;;  %p762_p13 = por %p761_p10, %p760_p7 }
  0x2a   : > { %p758_p6 = pneg %p757_p5  ;;  %p764_p1 = por %p763_p12, %p762_p13 }
  0x2c   : > { %p765_p2 = pnand %p764_p1, %p758_p6 }
  0x2e   : > { %768 = shalt.err (!%p765_p2)
}
  0x2f   : > { %s769_s9 = scalar_lea.vmem %s1088_s14, 128  ;;  %s964_s26 = smov [#allocation5]  }
  0x30   : > { %p770_p3 = scmp.ne.s32.totalorder %s1088_s14, %s769_s9  ;;  %s774_s10 = sshll.u32 %s964_s26, 4  ;;  %s775_s10 = int_to_ptr.vmem [resolvable:$false] %s774_s10 }
  0x31   : > { %s776_s5 = scalar_lea.vmem %s775_s10, 256  ;;  %p777_p9 = scmp.lt.s32.totalorder %s1088_s14, %s775_s10 }
  0x32   : > { %p772_p5 = pnand %p770_p3, %p1097_p4  ;;  %p778_p8 = scmp.lt.s32.totalorder %s776_s5, %s769_s9 }
  0x34   : > { %p773_p11 = pneg %p772_p5  ;;  %p779_p7 = por %p778_p8, %p777_p9 }
  0x36   : > { %p780_p10 = pnand %p779_p7, %p773_p11 }
  0x38   : > { %783 = shalt.err (!%p780_p10)
}
  0x39   : > { %s1385_s24 = smov 32   ;;  %s1387_s11 = smov 2  }
  0x3a   : > { %680 = dma.hbm_to_vmem [thread:$0]  (!%p1075_p0), %s1084_s12, 128, %s1088_s14, %s1091_s22, %s1385_s24, %s1385_s24, %s1387_s11  }
  0x3b   : > { %p1405_p8 = scmp.lt.s32.totalorder %s962_s20, 3  ;;  %p1406_p9 = scmp.ge.s32.totalorder %s962_s20, 1 }
  0x3c   : > { %s1136_s10 = scalar_lea.hbm %s1377_s0, %s1071_s7  ;;  %s214_s5 = scalar_lea.vmem [#allocation2], %s1068_s6 }
  0x3d   : > { %p1128_p11 = pnand %p1406_p9, %p1405_p8  ;;  %s223_s1 = sshll.u32 %s214_s5, 4  ;;  %s1139_s1 = int_to_ptr.vmem [resolvable:$true] %s223_s1 }
  0x3e   : > { %s1145_s24 = scalar_lea.hbm %s1379_s2, %s1071_s7  ;;  %s1408_s11 = sand.u32 1, %s950_s17  }
  0x3f   : > { %s1407_s13 = scalar_select %p1128_p11, 1, 0 }
  0x40   : > { %s1149_s23 = scalar_lea.sflag [#allocation3], %s1408_s11  ;;  %s784_s19 = scalar_lea.hbm %s1136_s10, 128 }
  0x41   : > { %p785_p12 = scmp.ne.s32.totalorder %s1136_s10, %s784_s19  ;;  %s789_s29 = scalar_lea.hbm %s1377_s0, 256 }
  0x42   : > { %p790_p6 = scmp.lt.u32.totalorder %s1136_s10, %s1377_s0  ;;  %p791_p13 = scmp.lt.u32.totalorder %s789_s29, %s784_s19 }
  0x43   : > { %p787_p1 = pnand %p785_p12, %p1097_p4  ;;  %p793_p5 = scmp.lt.u32.totalorder %s784_s19, %s1136_s10 }
  0x44   : > { %p792_p3 = por %p791_p13, %p790_p6 }
  0x45   : > { %p788_p2 = pneg %p787_p1 }
  0x46   : > { %p794_p7 = por %p793_p5, %p792_p3 }
  0x48   : > { %p795_p10 = pnand %p794_p7, %p788_p2 }
  0x4a   : > { %798 = shalt.err (!%p795_p10)
}
  0x4b   : > { %s799_s7 = scalar_lea.vmem %s1139_s1, 128  ;;  %s967_s11 = smov [#allocation2]  }
  0x4c   : > { %p800_p8 = scmp.ne.s32.totalorder %s1139_s1, %s799_s7  ;;  %s804_s12 = sshll.u32 %s967_s11, 4  ;;  %s805_s12 = int_to_ptr.vmem [resolvable:$false] %s804_s12 }
  0x4d   : > { %s806_s20 = scalar_lea.vmem %s805_s12, 256  ;;  %p807_p1 = scmp.lt.s32.totalorder %s1139_s1, %s805_s12 }
  0x4e   : > { %p802_p9 = pnand %p800_p8, %p1097_p4  ;;  %p808_p11 = scmp.lt.s32.totalorder %s806_s20, %s799_s7 }
  0x50   : > { %p803_p12 = pneg %p802_p9  ;;  %p809_p6 = por %p808_p11, %p807_p1 }
  0x52   : > { %p810_p13 = pnand %p809_p6, %p803_p12 }
  0x54   : > { %813 = shalt.err (!%p810_p13)
}
  0x55   : > { %s1409_s19 = smov 2   ;;  %s1410_s29 = smov 32  }
  0x56   : > { %677 = dma.hbm_to_vmem [thread:$0]  (!%p1075_p0), %s1136_s10, 128, %s1139_s1, %s1149_s23, %s1410_s29, %s1410_s29, %s1409_s19  }
  0x57   : > { %s260_s14 = scalar_lea.vmem [#allocation7], %s1068_s6  ;;  %s814_s26 = scalar_lea.hbm %s1145_s24, 128 }
  0x58   : > { %s269_s9 = sshll.u32 %s260_s14, 4  ;;  %p815_p11 = scmp.ne.s32.totalorder %s1145_s24, %s814_s26  ;;  %s1177_s9 = int_to_ptr.vmem [resolvable:$true] %s269_s9 }
  0x59   : > { %s819_s11 = scalar_lea.hbm %s1379_s2, 256  ;;  %p820_p5 = scmp.lt.u32.totalorder %s1145_s24, %s1379_s2 }
  0x5a   : > { %p817_p2 = pnand %p815_p11, %p1097_p4  ;;  %p821_p7 = scmp.lt.u32.totalorder %s819_s11, %s814_s26 }
  0x5b   : > { %p823_p8 = scmp.lt.u32.totalorder %s814_s26, %s1145_s24 }
  0x5c   : > { %p818_p3 = pneg %p817_p2  ;;  %p822_p10 = por %p821_p7, %p820_p5 }
  0x5e   : > { %p824_p9 = por %p823_p8, %p822_p10 }
  0x60   : > { %p825_p12 = pnand %p824_p9, %p818_p3 }
  0x62   : > { %828 = shalt.err (!%p825_p12)
}
  0x63   : > { %s829_s1 = scalar_lea.vmem %s1177_s9, 128  ;;  %s968_s23 = smov [#allocation7]  }
  0x64   : > { %p830_p1 = scmp.ne.s32.totalorder %s1177_s9, %s829_s1  ;;  %s834_s6 = sshll.u32 %s968_s23, 4  ;;  %s835_s6 = int_to_ptr.vmem [resolvable:$false] %s834_s6 }
  0x65   : > { %s836_s10 = scalar_lea.vmem %s835_s6, 256  ;;  %p837_p11 = scmp.lt.s32.totalorder %s1177_s9, %s835_s6 }
  0x66   : > { %p832_p6 = pnand %p830_p1, %p1097_p4  ;;  %p838_p2 = scmp.lt.s32.totalorder %s836_s10, %s829_s1 }
  0x68   : > { %p833_p13 = pneg %p832_p6  ;;  %p839_p5 = por %p838_p2, %p837_p11 }
  0x6a   : > { %p840_p7 = pnand %p839_p5, %p833_p13 }
  0x6c   : > { %843 = shalt.err (!%p840_p7)
}
  0x6d   : > { %683 = dma.hbm_to_vmem [thread:$0]  (!%p1075_p0), %s1145_s24, 128, %s1177_s9, %s1091_s22, %s1410_s29, %s1410_s29, %s1409_s19  }
  0x6e   : > { %p1411_p4 = scmp.ne.s32.totalorder %s1407_s13, 0 }
  0x6f   : > { %s1207_s25 = sand.u32 (!%p1411_p4), 1, %s946_s16   ;;  %p1412_p3 = scmp.ne.s32.totalorder (!%p1411_p4), %s1398_s27, 0 }
  0x70   : > { %281 = sbr.rel (%p1411_p4) target bundleno = 208 (0xd0), region = 32  ;;  %s650_s14 = sshll.u32 (!%p1411_p4), %s1207_s25, 3 }
  0x71   : > { %s284_s26 = scalar_lea.sflag (!%p1411_p4), [#allocation3], %s1207_s25  ;;  %s287_s5 = scalar_lea.vmem (!%p1411_p4), [#allocation2], %s650_s14 }
  0x77   : > { %925 = dma.done.wait (%p1412_p3), %s284_s26, 128  }
  0x78   : > { %927 = vsyncadd (%p1412_p3), %s284_s26, 4294967168  ;;  %s292_s8 = sand.u32 1, %s1028_s21   ;;  %s1216_s24 = scalar_lea.vmem [#allocation5], %s650_s14 }
  0x79   : > { %s293_s22 = scalar_lea.sflag [#allocation6], %s292_s8 }
  0x7a   : > { %929 = dma.done.wait (%p1412_p3), %s293_s22, 256  }
  0x7b   : > { %931 = vsyncadd (%p1412_p3), %s293_s22, 4294967040  ;;  %s653_s13 = sshll.u32 %s1207_s25, 1  ;;  %v969_v0 = vmov 0.0   ;;  %vm374_vm0 = vcmask 1041408   ;;  %s305_s21 = scalar_lea.vmem [#allocation7], %s650_s14 }
  0x7c   : > { %s1223_s19 = scalar_lea.vmem [#allocation8], %s653_s13  ;;  %s1226_s29 = scalar_lea.vmem [#allocation9], %s653_s13  ;;  %v1229_v1 = vld [vmem:[%s305_s21] sm:$0x3]  ;;  %v1231_v2 = vld [vmem:[%s305_s21 + $0x2] sm:$0x3] }
  0x7d   : > { %352 = vst [vmem:[%s1223_s19] sm:$0x3] %v969_v0  ;;  %353 = vst [vmem:[%s1226_s29] sm:$0x3] %v969_v0  ;;  %v1233_v3 = vld [vmem:[%s305_s21 + $0x4] sm:$0x3]  ;;  %v1235_v4 = vld [vmem:[%s305_s21 + $0x6] sm:$0x3] }
  0x7e   : > { %v358_v5 = vld [vmem:[%s287_s5] sm:$0x3]  ;;  %v359_v6 = vld [vmem:[%s287_s5 + $0x2] sm:$0x3]  ;;  %v360_v7 = vld [vmem:[%s287_s5 + $0x4] sm:$0x3] }
  0x7f   : > { %v361_v8 = vld [vmem:[%s287_s5 + $0x6] sm:$0x3]  ;;  %v366_v9 = vmul.f32 %v358_v5, %v1229_v1  ;;  %v367_v10 = vmul.f32 %v359_v6, %v1231_v2  ;;  %v368_v11 = vmul.f32 %v360_v7, %v1233_v3  ;;  %v422_v17 = vsel %vm374_vm0, %v1229_v1, 0.0  ;;  %s657_s27 = sshll.u32 %s954_s18, 5  ;;  %s467_s9 = sshll.u32 %s1226_s29, 4  ;;  %s1275_s9 = int_to_ptr.vmem [resolvable:$true] %s467_s9 }
  0x80   : > { %v369_v12 = vmul.f32 %v361_v8, %v1235_v4  ;;  %v423_v20 = vsel %vm374_vm0, %v1231_v2, 0.0  ;;  %v425_v21 = vsel %vm374_vm0, %v1233_v3, 0.0  ;;  %v427_v24 = vsel %vm374_vm0, %v1235_v4, 0.0  ;;  %s1273_s12 = scalar_lea.hbm %s1381_s4, %s657_s27  ;;  %s437_s20 = scalar_lea.sflag [#allocation10], %s1207_s25 }
  0x81   : > { %v375_v13 = vsel %vm374_vm0, %v366_v9, -inf  ;;  %v376_v14 = vsel %vm374_vm0, %v367_v10, -inf  ;;  %v377_v15 = vsel %vm374_vm0, %v368_v11, -inf  ;;  %v424_v22 = vadd.f32 %v423_v20, %v422_v17  ;;  %s844_s1 = scalar_lea.vmem %s1275_s9, 32  ;;  %p1413_p10 = scmp.ne.s32.totalorder %s1399_s28, 0 }
  0x82   : > { %v378_v16 = vsel %vm374_vm0, %v369_v12, -inf  ;;  %v379_v18 = vmax.f32 %v375_v13, %v376_v14  ;;  %p845_p0 = scmp.ne.s32.totalorder %s1275_s9, %s844_s1  ;;  %s970_s23 = smov [#allocation9]  }
  0x83   : > { %v380_v19 = vmax.f32 %v377_v15, %v378_v16  ;;  %v426_v25 = vadd.f32 %v425_v21, %v424_v22  ;;  %s848_s6 = sshll.u32 %s970_s23, 4  ;;  %s849_s6 = int_to_ptr.vmem [resolvable:$false] %s848_s6 }
  0x84   : > { %v421_v30 = vld [vmem:[%s1226_s29] sm:$0x3]  ;;  %p846_p8 = pnand %p845_p0, %p1413_p10  ;;  %s850_s10 = scalar_lea.vmem %s849_s6, 64 }
  0x85   : > { %v381_v23 = vmax.f32 %v379_v18, %v380_v19  ;;  %v428_v31 = vadd.f32 %v427_v24, %v426_v25  ;;  %p851_p12 = scmp.lt.s32.totalorder %s1275_s9, %s849_s6  ;;  %p852_p1 = scmp.lt.s32.totalorder %s850_s10, %s844_s1 }
  0x86   : > { %p847_p9 = pneg %p846_p8 }
  0x87   : > { %v1253_v26 = vsub.f32 %v366_v9, %v381_v23  ;;  %v1255_v27 = vsub.f32 %v367_v10, %v381_v23  ;;  %v1257_v28 = vsub.f32 %v368_v11, %v381_v23  ;;  %v1259_v29 = vsub.f32 %v369_v12, %v381_v23  ;;  %p853_p6 = por %p852_p1, %p851_p12 }
  0x88   : > { %v429_v36 = vadd.f32 %v428_v31, %v421_v30 }
  0x89   : > { %v386_v32 = vmul.f32 1.442695, %v1253_v26  ;;  %v388_v33 = vmul.f32 1.442695, %v1255_v27  ;;  %v390_v34 = vmul.f32 1.442695, %v1257_v28  ;;  %p854_p13 = pnand %p853_p6, %p847_p9 }
  0x8a   : > { %v392_v35 = vmul.f32 1.442695, %v1259_v29  ;;  %430 = vst [vmem:[%s1226_s29] sm:$0x3] %v429_v36 }
  0x8b   : > { %744 = vpow2.f32 %v386_v32 }
  0x8c   : > { %746 = vpow2.f32 %v388_v33 }
  0x8d   : > { %748 = vpow2.f32 %v390_v34 }
  0x8e   : > { %857 = shalt.err (!%p854_p13)
}
  0x8f   : > { %s858_s14 = scalar_lea.hbm %s1273_s12, 32  ;;  %s862_s8 = scalar_lea.hbm %s1381_s4, 64 }
  0x90   : > { %p859_p11 = scmp.ne.s32.totalorder %s1273_s12, %s858_s14  ;;  %p863_p7 = scmp.lt.u32.totalorder %s1273_s12, %s1381_s4 }
  0x91   : > { %p864_p4 = scmp.lt.u32.totalorder %s862_s8, %s858_s14  ;;  %p866_p0 = scmp.lt.u32.totalorder %s858_s14, %s1273_s12 }
  0x92   : > { %p860_p2 = pnand %p859_p11, %p1413_p10 }
  0x93   : > { %p865_p3 = por %p864_p4, %p863_p7 }
  0x94   : > { %p861_p5 = pneg %p860_p2 }
  0x95   : > { %p867_p8 = por %p866_p0, %p865_p3 }
  0x97   : > { %p868_p9 = pnand %p867_p8, %p861_p5 }
  0x99   : > { %871 = shalt.err (!%p868_p9)
}
  0x9a   : > { %671 = dma.vmem_to_hbm [thread:$0]  (%p1413_p10), %s1275_s9, 32, %s1273_s12, %s437_s20   ;;  %750 = vpow2.f32 %v392_v35  ;;  %v745_v37 = vpop.eup %744  ;;  %v362_v48 = vld [vmem:[%s1216_s24] sm:$0x3]  ;;  %v363_v49 = vld [vmem:[%s1216_s24 + $0x2] sm:$0x3] }
  0x9b   : > { %v747_v38 = vpop.eup %746  ;;  %v394_v39 = vsel %vm374_vm0, %v745_v37, 0.0  ;;  %v364_v50 = vld [vmem:[%s1216_s24 + $0x4] sm:$0x3]  ;;  %v365_v51 = vld [vmem:[%s1216_s24 + $0x6] sm:$0x3]  ;;  %v370_v53 = vmul.f32 %v362_v48, %v1229_v1  ;;  %v371_v54 = vmul.f32 %v363_v49, %v1231_v2  ;;  %s452_s24 = sshll.u32 %s1223_s19, 4  ;;  %s1327_s9 = scalar_lea.hbm %s1380_s3, %s657_s27  ;;  %s1329_s24 = int_to_ptr.vmem [resolvable:$true] %s452_s24 }
  0x9c   : > { %v749_v40 = vpop.eup %748  ;;  %v395_v41 = vsel %vm374_vm0, %v747_v38, 0.0  ;;  %v372_v55 = vmul.f32 %v364_v50, %v1233_v3  ;;  %v373_v56 = vmul.f32 %v365_v51, %v1235_v4  ;;  %v411_v8 = vld [vmem:[%s1223_s19] sm:$0x3]  ;;  %s432_s7 = scalar_lea.sflag [#allocation4], %s1207_s25  ;;  %s872_s11 = scalar_lea.vmem %s1329_s24, 32 }
  0x9d   : > { %v396_v43 = vadd.f32 %v395_v41, %v394_v39  ;;  %v397_v44 = vsel %vm374_vm0, %v749_v40, 0.0  ;;  %p873_p12 = scmp.ne.s32.totalorder %s1329_s24, %s872_s11  ;;  %s971_s12 = smov [#allocation8]  }
  0x9e   : > { %s876_s20 = sshll.u32 %s971_s12, 4  ;;  %s877_s20 = int_to_ptr.vmem [resolvable:$false] %s876_s20 }
  0x9f   : > { %v398_v46 = vadd.f32 %v397_v44, %v396_v43  ;;  %p874_p1 = pnand %p873_p12, %p1413_p10  ;;  %s878_s18 = scalar_lea.vmem %s877_s20, 64 }
  0xa0   : > { %p879_p13 = scmp.lt.s32.totalorder %s1329_s24, %s877_s20  ;;  %p880_p11 = scmp.lt.s32.totalorder %s878_s18, %s872_s11 }
  0xa1   : > { %p875_p6 = pneg %p874_p1 }
  0xa2   : > { %p881_p2 = por %p880_p11, %p879_p13 }
  0xa4   : > { %v751_v42 = vpop.eup %750  ;;  %p882_p5 = pnand %p881_p2, %p875_p6 }
  0xa5   : > { %v399_v45 = vsel %vm374_vm0, %v751_v42, 0.0 }
  0xa6   : > { %v400_v47 = vadd.f32 %v399_v45, %v398_v46 }
  0xa8   : > { %752 = vlog2.f32 %v400_v47 }
  0xb2   : > { %v753_v52 = vpop.eup %752 }
  0xb3   : > { %v402_v57 = vmul.f32 0.6931472, %v753_v52 }
  0xb5   : > { %v403_v58 = vsub.f32 %v1253_v26, %v402_v57  ;;  %v404_v59 = vsub.f32 %v1255_v27, %v402_v57  ;;  %v405_v60 = vsub.f32 %v1257_v28, %v402_v57  ;;  %v406_v61 = vsub.f32 %v1259_v29, %v402_v57 }
  0xb7   : > { %v407_v62 = vmul.f32 %v403_v58, %v370_v53  ;;  %v408_v63 = vmul.f32 %v404_v59, %v371_v54  ;;  %v409_v0 = vmul.f32 %v405_v60, %v372_v55  ;;  %v410_v1 = vmul.f32 %v406_v61, %v373_v56 }
  0xb9   : > { %v412_v2 = vsel %vm374_vm0, %v407_v62, 0.0  ;;  %v413_v3 = vsel %vm374_vm0, %v408_v63, 0.0  ;;  %v415_v4 = vsel %vm374_vm0, %v409_v0, 0.0  ;;  %v417_v6 = vsel %vm374_vm0, %v410_v1, 0.0 }
  0xba   : > { %v414_v5 = vadd.f32 %v413_v3, %v412_v2 }
  0xbc   : > { %v416_v7 = vadd.f32 %v415_v4, %v414_v5 }
  0xbe   : > { %v418_v9 = vadd.f32 %v417_v6, %v416_v7 }
  0xc0   : > { %v419_v10 = vadd.f32 %v418_v9, %v411_v8 }
  0xc2   : > { %420 = vst [vmem:[%s1223_s19] sm:$0x3] %v419_v10 }
  0xc3   : > { %885 = shalt.err (!%p882_p5)
}
  0xc4   : > { %s886_s25 = scalar_lea.hbm %s1327_s9, 32  ;;  %s890_s1 = scalar_lea.hbm %s1380_s3, 64 }
  0xc5   : > { %p887_p7 = scmp.ne.s32.totalorder %s1327_s9, %s886_s25  ;;  %p891_p0 = scmp.lt.u32.totalorder %s1327_s9, %s1380_s3 }
  0xc6   : > { %p892_p8 = scmp.lt.u32.totalorder %s890_s1, %s886_s25  ;;  %p894_p12 = scmp.lt.u32.totalorder %s886_s25, %s1327_s9 }
  0xc7   : > { %p888_p4 = pnand %p887_p7, %p1413_p10 }
  0xc8   : > { %p893_p9 = por %p892_p8, %p891_p0 }
  0xc9   : > { %p889_p3 = pneg %p888_p4 }
  0xca   : > { %p895_p1 = por %p894_p12, %p893_p9 }
  0xcc   : > { %p896_p6 = pnand %p895_p1, %p889_p3 }
  0xce   : > { %899 = shalt.err (!%p896_p6)
}
  0xcf   : > { %670 = dma.vmem_to_hbm [thread:$0]  (%p1413_p10), %s1329_s24, 32, %s1327_s9, %s432_s7  }
  0xd0 PF: > { %s1414_s10 = sld [smem:[#allocation16_spill]]  ;;  %s479_s14 = sand.u32 1, %s942_s15  }
  0xd1   : > { %p1415_p13 = scmp.ne.s32.totalorder %s1401_s30, 0  ;;  %s480_s26 = scalar_lea.sflag [#allocation4], %s479_s14 }
  0xd6   : > { %p1416_p11 = scmp.ge.s32.totalorder %s1414_s10, 2 }
  0xd8   : > { %p685_p2 = pnand %p1416_p11, %p1415_p13 }
  0xda   : > { %933 = dma.done.wait (!%p685_p2), %s480_s26, 32  }
  0xdb   : > { %935 = vsyncadd (!%p685_p2), %s480_s26, 4294967264  ;;  %s489_s5 = scalar_lea.sflag [#allocation10], %s479_s14 }
  0xdc   : > { %937 = dma.done.wait (!%p685_p2), %s489_s5, 32  }
  0xdd   : > { %939 = vsyncadd (!%p685_p2), %s489_s5, 4294967264  ;;  %s27_s20 = sadd.s32 1, %s1414_s10   ;;  %s1417_s28 = sld [smem:[#allocation18_spill]] }
  0xde   : > { %p24_p5 = scmp.ge.s32.totalorder %s27_s20, 4   ;;  %s1418_s18 = sld [smem:[#allocation15_spill]] }
  0xdf   : > { %s1419_s19 = sld [smem:[#allocation17_spill]]  ;;  %s1420_s15 = smov %s946_s16 }
  0xe0   : > { %s1421_s16 = smov %s950_s17  ;;  %26 = sbr.rel (!%p24_p5) target bundleno = 12 (0xc), region = 122 }
  0xe3   : > { %s1422_s17 = smov %s1417_s28 }
  0xe7   :  { %494 = vsyncpa [#allocation3], 1 }
  0xe8   :  { %496 = vsyncpa [#allocation3 + $0x1], 1 }
  0xe9   :  { %497 = vsyncpa [#allocation6], 1 }
  0xea   :  { %499 = vsyncpa [#allocation6 + $0x1], 1 }
  0xeb   :  { %500 = vsyncpa [#allocation4], 1 }
  0xec   :  { %502 = vsyncpa [#allocation4 + $0x1], 1 }
  0xed   :  { %503 = vsyncpa [#allocation10], 1 }
  0xee   :  { %505 = vsyncpa [#allocation10 + $0x1], 1 }

</bundles_post_ra>
